<compile_context>
chip_gen: v6e
topology: v6e:2x2x1
jax: 0.10.0
libtpu: 0.0.40
codegen_flags: <defaults>
</compile_context>

<pallas_src>
import functools

import jax
import jax.numpy as jnp
from jax.experimental import pallas as pl
from jax.experimental.pallas import tpu as pltpu


def _round_up(n, m):
    return ((n + m - 1) // m) * m


def _pick_tf(d_ff, target):
    """Largest lane-aligned (multiple-of-128) divisor of d_ff that is <= target."""
    if d_ff <= target:
        return d_ff
    for tf in range(target - (target % 128), 127, -128):
        if tf > 0 and d_ff % tf == 0:
            return tf
    return d_ff  # fall back to fully-resident weights


def ffn_kernel(x_ref, w1_ref, b1_ref, w2_ref, b2_ref, o_ref, acc_ref):
    # x_ref: (tm, d_model)        w1_ref: (d_model, tf)   b1_ref: (1, tf)
    # w2_ref: (tf, d_model)       b2_ref: (1, d_model)
    # o_ref:  (tm, d_model)       acc_ref: (tm, d_model) f32 scratch
    k = pl.program_id(1)

    @pl.when(k == 0)
    def _init():
        acc_ref[...] = jnp.zeros_like(acc_ref)

    # First matmul on this d_ff chunk (MXU, f32 accumulation), bias + ReLU.
    h = jnp.dot(x_ref[...], w1_ref[...], preferred_element_type=jnp.float32)
    h = jnp.maximum(h + b1_ref[...], 0.0)
    # Dropout == identity (eval mode).
    # Second matmul: accumulate this chunk's contribution in f32.
    acc_ref[...] += jnp.dot(h.astype(w2_ref.dtype), w2_ref[...],
                            preferred_element_type=jnp.float32)

    @pl.when(k == pl.num_programs(1) - 1)
    def _finalize():
        # b2 added exactly once; single lane-dense store in the I/O dtype.
        o_ref[...] = (acc_ref[...] + b2_ref[...]).astype(o_ref.dtype)


def ffn_pallas(x, w1_t, b1, w2_t, b2, *, tm=256, tf=512,
               compute_dtype=jnp.bfloat16):
    """x: (M, d_model); w1_t: (d_model, d_ff); w2_t: (d_ff, d_model)."""
    M, d_model = x.shape
    d_ff = w1_t.shape[1]
    out_dtype = x.dtype

    # Row tile: large (default 256) but never larger than the (8-aligned) row
    # count; pad rows with zeros so the grid divides exactly.
    # Note (v7x): for big M prefer tm = min(512, M // 2) so the parallel axis
    # has >= 2 steps and both TensorCores stay busy.
    tm = min(tm, _round_up(M, 8))
    M_pad = _round_up(M, tm)
    if M_pad != M:
        x = jnp.pad(x, ((0, M_pad - M), (0, 0)))

    # d_ff reduction tile (lane-aligned divisor of d_ff).
    tf = _pick_tf(d_ff, tf)

    # Cast MXU operands to the compute dtype (bf16 by default); biases stay f32.
    xc = x.astype(compute_dtype)
    w1c = w1_t.astype(compute_dtype)
    w2c = w2_t.astype(compute_dtype)
    b1c = b1.astype(jnp.float32)
    b2c = b2.astype(jnp.float32)

    grid = (M_pad // tm, d_ff // tf)

    # VMEM budget: double-buffered tiles + f32 accumulator, with headroom,
    # capped at 60 MiB so it stays inside v7x's 64 MiB per-core VMEM.
    cb = jnp.dtype(compute_dtype).itemsize
    ob = jnp.dtype(out_dtype).itemsize
    tile_bytes = (2 * tm * d_model * cb          # x double buffer
                  + 2 * d_model * tf * cb        # W1 chunk double buffer
                  + 2 * tf * 4                   # b1 chunk
                  + 2 * tf * d_model * cb        # W2 chunk double buffer
                  + 2 * d_model * 4              # b2
                  + 2 * tm * d_model * ob        # out double buffer
                  + tm * d_model * 4)            # f32 accumulator
    vmem_limit = int(min(60 * 1024 * 1024, max(32 * 1024 * 1024, 2 * tile_bytes)))

    bytes_accessed = (M_pad * d_model * cb            # x
                      + d_model * d_ff * cb           # W1
                      + d_ff * 4                      # b1
                      + d_ff * d_model * cb           # W2
                      + d_model * 4                   # b2
                      + M_pad * d_model * ob)         # out
    cost = pl.CostEstimate(flops=4 * M_pad * d_model * d_ff,
                           transcendentals=0,
                           bytes_accessed=bytes_accessed)

    out = pl.pallas_call(
        ffn_kernel,
        out_shape=jax.ShapeDtypeStruct((M_pad, d_model), out_dtype),
        grid_spec=pltpu.PrefetchScalarGridSpec(
            num_scalar_prefetch=0,
            grid=grid,
            in_specs=[
                pl.BlockSpec((tm, d_model), lambda i, k: (i, 0)),   # x tile
                pl.BlockSpec((d_model, tf), lambda i, k: (0, k)),   # W1^T chunk
                pl.BlockSpec((1, tf), lambda i, k: (0, k)),         # b1 chunk
                pl.BlockSpec((tf, d_model), lambda i, k: (k, 0)),   # W2^T chunk
                pl.BlockSpec((1, d_model), lambda i, k: (0, 0)),    # b2
            ],
            out_specs=pl.BlockSpec((tm, d_model), lambda i, k: (i, 0)),
            scratch_shapes=[pltpu.VMEM((tm, d_model), jnp.float32)],
        ),
        compiler_params=pltpu.CompilerParams(
            dimension_semantics=("parallel", "arbitrary"),
            vmem_limit_bytes=vmem_limit,
        ),
        cost_estimate=cost,
    )(xc, w1c, b1c, w2c, b2c)

    return out[:M] if M_pad != M else out


def ffn_forward(x, params, *, tm=256, tf=512, compute_dtype=jnp.bfloat16):
    """x: (..., d_model) -> (..., d_model), matching FFN.forward (eval mode)."""
    w1_t, b1, w2_t, b2 = params
    d_model = x.shape[-1]
    lead = x.shape[:-1]
    x2d = x.reshape(-1, d_model)
    y2d = ffn_pallas(x2d, w1_t, b1, w2_t, b2, tm=tm, tf=tf,
                     compute_dtype=compute_dtype)
    return y2d.reshape(*lead, d_model)


def init_ffn_params(key, d_model, exp_factor, dtype=jnp.float32):
    """Deterministic init mirroring nn.Linear's U(-1/sqrt(fan_in), 1/sqrt(fan_in))."""
    d_ff = d_model * exp_factor
    k1, k2, k3, k4 = jax.random.split(key, 4)
    bound1 = 1.0 / jnp.sqrt(d_model)
    bound2 = 1.0 / jnp.sqrt(d_ff)
    # Stored pre-transposed: (in_features, out_features).
    w1_t = jax.random.uniform(k1, (d_model, d_ff), dtype, -bound1, bound1)
    b1 = jax.random.uniform(k2, (1, d_ff), dtype, -bound1, bound1)
    w2_t = jax.random.uniform(k3, (d_ff, d_model), dtype, -bound2, bound2)
    b2 = jax.random.uniform(k4, (1, d_model), dtype, -bound2, bound2)
    return w1_t, b1, w2_t, b2


def ffn_reference(x, params, *, compute_dtype=jnp.bfloat16):
    """Pure-JAX reference replicating the kernel's compute-dtype rounding."""
    w1_t, b1, w2_t, b2 = params
    f32 = jnp.float32
    xc = x.astype(compute_dtype).astype(f32)
    w1c = w1_t.astype(compute_dtype).astype(f32)
    w2c = w2_t.astype(compute_dtype).astype(f32)
    h = jnp.maximum(xc @ w1c + b1[0].astype(f32), 0.0)
    hc = h.astype(compute_dtype).astype(f32)
    y = hc @ w2c + b2[0].astype(f32)
    return y.astype(x.dtype)


if __name__ == "__main__":
    d_model = 128
    exp_factor = 4            # d_ff = 512
    batch, seq = 2, 8         # M = 16 tokens (toy shapes; tm auto-clamps)

    key = jax.random.PRNGKey(0)
    kx, kp = jax.random.split(key)
    x = jax.random.normal(kx, (batch, seq, d_model), jnp.float32)
    params = init_ffn_params(kp, d_model, exp_factor)

    # bf16 MXU path (default); tf=128 exercises the d_ff-reduction accumulator.
    fwd_bf16 = jax.jit(functools.partial(ffn_forward, tf=128,
                                         compute_dtype=jnp.bfloat16))
    y = jax.block_until_ready(fwd_bf16(x, params))
    y_ref = ffn_reference(x.reshape(-1, d_model), params,
                          compute_dtype=jnp.bfloat16).reshape(x.shape)
    assert y.shape == x.shape
    assert jnp.allclose(y, y_ref, atol=2e-3, rtol=2e-3), "bf16 path mismatch"

    # f32 sanity path (single d_ff chunk, full-precision compute dtype).
    fwd_f32 = jax.jit(functools.partial(ffn_forward,
                                        compute_dtype=jnp.float32))
    y32 = jax.block_until_ready(fwd_f32(x, params))
    y32_ref = ffn_reference(x.reshape(-1, d_model), params,
                            compute_dtype=jnp.float32).reshape(x.shape)
    assert jnp.allclose(y32, y32_ref, atol=5e-3, rtol=5e-3), "f32 path mismatch"

    print("KERNEL_OK")
</pallas_src>

<mosaic_0001>
module attributes {stable_mosaic.version = 11 : i64} {
  func.func @ffn_kernel(%arg0: i32, %arg1: i32, %arg2: memref<16x128xbf16, #tpu.memory_space<vmem>>, %arg3: memref<128x128xbf16, #tpu.memory_space<vmem>>, %arg4: memref<1x128xf32, #tpu.memory_space<vmem>>, %arg5: memref<128x128xbf16, #tpu.memory_space<vmem>>, %arg6: memref<1x128xf32, #tpu.memory_space<vmem>>, %arg7: memref<16x128xf32, #tpu.memory_space<vmem>>, %arg8: memref<16x128xf32, #tpu.memory_space<vmem>>) attributes {dimension_semantics = [#tpu.dimension_semantics<parallel>, #tpu.dimension_semantics<arbitrary>], iteration_bounds = array<i64: 1, 4>, scalar_prefetch = 0 : i64, scratch_operands = 1 : i64, tpu.core_type = #tpu.core_type<tc>, window_params = [{transform_indices = @transform_0, window_bounds = array<i64: 16, 128>}, {transform_indices = @transform_1, window_bounds = array<i64: 128, 128>}, {transform_indices = @transform_2, window_bounds = array<i64: 1, 128>}, {transform_indices = @transform_3, window_bounds = array<i64: 128, 128>}, {pipeline_mode = #tpu.pipeline_mode<synchronous>, transform_indices = @transform_4, window_bounds = array<i64: 1, 128>}, {transform_indices = @transform_5, window_bounds = array<i64: 16, 128>}]} {
    %c0_i32 = arith.constant 0 : i32
    %0 = arith.cmpi eq, %arg1, %c0_i32 : i32
    %1 = arith.extui %0 : i1 to i32
    %c0_i32_0 = arith.constant 0 : i32
    %2 = arith.cmpi ne, %1, %c0_i32_0 : i32
    scf.if %2 {
      %cst_15 = arith.constant 0.000000e+00 : f32
      %20 = vector.broadcast %cst_15 : f32 to vector<16x128xf32>
      %c0_16 = arith.constant 0 : index
      %c0_17 = arith.constant 0 : index
      %21 = vector.load %arg8[%c0_16, %c0_17] : memref<16x128xf32, #tpu.memory_space<vmem>>, vector<16x128xf32>
      tpu.vector_store %arg8[%c0_16, %c0_17], %20 {strides = array<i32>} : memref<16x128xf32, #tpu.memory_space<vmem>>, vector<16x128xf32>,
    } else {
    }
    %c0 = arith.constant 0 : index
    %c0_1 = arith.constant 0 : index
    %3 = vector.load %arg2[%c0, %c0_1] : memref<16x128xbf16, #tpu.memory_space<vmem>>, vector<16x128xbf16>
    %c0_2 = arith.constant 0 : index
    %c0_3 = arith.constant 0 : index
    %4 = vector.load %arg3[%c0_2, %c0_3] : memref<128x128xbf16, #tpu.memory_space<vmem>>, vector<128x128xbf16>
    %cst = arith.constant dense<0.000000e+00> : vector<16x128xf32>
    %5 = tpu.matmul %3, %4, %cst {dimension_numbers = #tpu.dot_dimension_numbers<[1], [0], [0], [1], [0, 0, 1, 1], [], []>} : vector<16x128xbf16>, vector<128x128xbf16>, vector<16x128xf32> -> vector<16x128xf32>
    %c0_4 = arith.constant 0 : index
    %c0_5 = arith.constant 0 : index
    %6 = vector.load %arg4[%c0_4, %c0_5] : memref<1x128xf32, #tpu.memory_space<vmem>>, vector<1x128xf32>
    %7 = vector.broadcast %6 : vector<1x128xf32> to vector<16x128xf32>
    %8 = arith.addf %5, %7 : vector<16x128xf32>
    %cst_6 = arith.constant 0.000000e+00 : f32
    %9 = vector.broadcast %cst_6 : f32 to vector<16x128xf32>
    %10 = arith.maximumf %8, %9 : vector<16x128xf32>
    %c0_7 = arith.constant 0 : index
    %c0_8 = arith.constant 0 : index
    %11 = vector.load %arg8[%c0_7, %c0_8] : memref<16x128xf32, #tpu.memory_space<vmem>>, vector<16x128xf32>
    %12 = arith.truncf %10 : vector<16x128xf32> to vector<16x128xbf16>
    %c0_9 = arith.constant 0 : index
    %c0_10 = arith.constant 0 : index
    %13 = vector.load %arg5[%c0_9, %c0_10] : memref<128x128xbf16, #tpu.memory_space<vmem>>, vector<128x128xbf16>
    %cst_11 = arith.constant dense<0.000000e+00> : vector<16x128xf32>
    %14 = tpu.matmul %12, %13, %cst_11 {dimension_numbers = #tpu.dot_dimension_numbers<[1], [0], [0], [1], [0, 0, 1, 1], [], []>} : vector<16x128xbf16>, vector<128x128xbf16>, vector<16x128xf32> -> vector<16x128xf32>
    %15 = arith.addf %11, %14 : vector<16x128xf32>
    %c0_12 = arith.constant 0 : index
    %c0_13 = arith.constant 0 : index
    %16 = vector.load %arg8[%c0_12, %c0_13] : memref<16x128xf32, #tpu.memory_space<vmem>>, vector<16x128xf32>
    tpu.vector_store %arg8[%c0_12, %c0_13], %15 {strides = array<i32>} : memref<16x128xf32, #tpu.memory_space<vmem>>, vector<16x128xf32>,
    %c3_i32 = arith.constant 3 : i32
    %17 = arith.cmpi eq, %arg1, %c3_i32 : i32
    %18 = arith.extui %17 : i1 to i32
    %c0_i32_14 = arith.constant 0 : i32
    %19 = arith.cmpi ne, %18, %c0_i32_14 : i32
    scf.if %19 {
      %c0_15 = arith.constant 0 : index
      %c0_16 = arith.constant 0 : index
      %20 = vector.load %arg8[%c0_15, %c0_16] : memref<16x128xf32, #tpu.memory_space<vmem>>, vector<16x128xf32>
      %c0_17 = arith.constant 0 : index
      %c0_18 = arith.constant 0 : index
      %21 = vector.load %arg6[%c0_17, %c0_18] : memref<1x128xf32, #tpu.memory_space<vmem>>, vector<1x128xf32>
      %22 = vector.broadcast %21 : vector<1x128xf32> to vector<16x128xf32>
      %23 = arith.addf %20, %22 : vector<16x128xf32>
      %c0_19 = arith.constant 0 : index
      %c0_20 = arith.constant 0 : index
      %24 = vector.load %arg7[%c0_19, %c0_20] : memref<16x128xf32, #tpu.memory_space<vmem>>, vector<16x128xf32>
      tpu.vector_store %arg7[%c0_19, %c0_20], %23 {strides = array<i32>} : memref<16x128xf32, #tpu.memory_space<vmem>>, vector<16x128xf32>,
    } else {
    }
    return
  }
  func.func @transform_0(%arg0: i32, %arg1: i32) -> (i32, i32) {
    %c0_i32 = arith.constant 0 : i32
    %c0_i32_0 = arith.constant 0 : i32
    return %arg0, %c0_i32 : i32, i32
  }
  func.func @transform_1(%arg0: i32, %arg1: i32) -> (i32, i32) {
    %c0_i32 = arith.constant 0 : i32
    %c0_i32_0 = arith.constant 0 : i32
    return %c0_i32, %arg1 : i32, i32
  }
  func.func @transform_2(%arg0: i32, %arg1: i32) -> (i32, i32) {
    %c0_i32 = arith.constant 0 : i32
    %c0_i32_0 = arith.constant 0 : i32
    return %c0_i32, %arg1 : i32, i32
  }
  func.func @transform_3(%arg0: i32, %arg1: i32) -> (i32, i32) {
    %c0_i32 = arith.constant 0 : i32
    %c0_i32_0 = arith.constant 0 : i32
    return %arg1, %c0_i32 : i32, i32
  }
  func.func @transform_4(%arg0: i32, %arg1: i32) -> (i32, i32) {
    %c0_i32 = arith.constant 0 : i32
    %c0_i32_0 = arith.constant 0 : i32
    %c0_i32_1 = arith.constant 0 : i32
    return %c0_i32, %c0_i32_0 : i32, i32
  }
  func.func @transform_5(%arg0: i32, %arg1: i32) -> (i32, i32) {
    %c0_i32 = arith.constant 0 : i32
    %c0_i32_0 = arith.constant 0 : i32
    return %arg0, %c0_i32 : i32, i32
  }
}

</mosaic_0001>

<bundles_post_ra>
// kernel: ffn_forward.1
= control target key start
LH: loop header
LB: loop body
LE: loop exit
PB: predicated region body
PF: predicated region fallthrough
CT: control target
= control target key end

     0   :  { %10 = vsyncpa [#allocation5], 0  ;;  %s1018_s18 = smov 0   ;;  %s1020_s19 = smov 0   ;;  %s1160_s0 = inlined_call_operand.vmem [shape: bf16[16,128], index: 0, kind: input, shape index: {}]   ;;  %s1161_s1 = inlined_call_operand.vmem [shape: bf16[128,512], index: 1, kind: input, shape index: {}]   ;;  %s1162_s2 = inlined_call_operand.vmem [shape: f32[1,512], index: 2, kind: input, shape index: {}]   ;;  %s1163_s3 = inlined_call_operand.vmem [shape: bf16[512,128], index: 3, kind: input, shape index: {}]   ;;  %s1164_s4 = inlined_call_operand.vmem [shape: f32[1,128], index: 4, kind: input, shape index: {}]   ;;  %s1165_s5 = inlined_call_operand.hbm [shape: f32[16,128], index: 5, kind: output, shape index: {}]  }
   0x1   :  { %s1022_s20 = smov 0   ;;  %s1024_s21 = smov 0  }
   0x2   :  { %s1026_s22 = smov 0  }
   0x3 LB: > { %s752_s23 = sadd.s32 4294967295, %s980_s22   ;;  %s25_s24 = sadd.s32 1, %s976_s21  ;;  %s980_s22 = sphi %s1026_s22, %s16_s22   ;;  %s976_s21 = sphi %s1024_s21, %s1170_s21   ;;  %s972_s20 = sphi %s1022_s20, %s1169_s20   ;;  %s968_s19 = sphi %s1020_s19, %s1168_s19   ;;  %s964_s18 = sphi %s1018_s18, %s1167_s18  }
   0x4   : > { %p26_p0 = scmp.ge.s32.totalorder %s25_s24, 4  ;;  %p68_p1 = scmp.ne.s32.totalorder %s968_s19, %s964_s18 }
   0x5   : > { %p69_p2 = scmp.eq.s32.totalorder %s980_s22, 0  ;;  %s61_s26 = sadd.s32 1, %s968_s19 }
   0x6   : > { %s1172_s24 = smov (%p26_p0, %s25_s24), 0  ;;  %p755_p5 = scmp.ge.s32.totalorder %s980_s22, 4 }
   0x7   : > { %p70_p3 = por %p69_p2, %p68_p1  ;;  %s58_s25 = ssub.s32 %s976_s21, %s1172_s24 }
   0x8   : > { %p59_p4 = scmp.eq.s32.totalorder %s58_s25, 0  ;;  %205 = sbr.rel (%p755_p5) target bundleno = 28 (0x1c), region = 24 }
   0xa   : > { %s1054_s27 = scalar_select %p59_p4, %s968_s19, %s61_s26  }
   0xd   : > { %208 = sbr.rel (!%p70_p3) target bundleno = 28 (0x1c), region = 28  ;;  %s210_s28 = sand.u32 (%p70_p3), 1, %s968_s19  }
   0xe   : > { %s757_s29 = sshll.u32 (%p70_p3), %s976_s21, 2  ;;  %s756_s30 = sshll.u32 (%p70_p3), %s210_s28, 6 }
   0xf   : > { %s1062_s8 = scalar_lea.vmem (%p70_p3), %s1161_s1, %s757_s29  ;;  %s212_s9 = scalar_lea.vmem (%p70_p3), [#allocation3], %s756_s30 }
  0x10   : > { %v231_v0 = vld [vmem:[%s1062_s8] sm:$0xf] (%p70_p3)  ;;  %v233_v1 = vld [vmem:[%s1062_s8 + $0x10] sm:$0xf] (%p70_p3) }
  0x11   : > { %232 = vst [vmem:[%s212_s9] sm:$0xf] (%p70_p3), %v231_v0  ;;  %234 = vst [vmem:[%s212_s9 + $0x4] sm:$0xf] (%p70_p3), %v233_v1  ;;  %v235_v2 = vld [vmem:[%s1062_s8 + $0x20] sm:$0xf] (%p70_p3) }
  0x12   : > { %v237_v3 = vld [vmem:[%s1062_s8 + $0x30] sm:$0xf]  ;;  %v239_v4 = vld [vmem:[%s1062_s8 + $0x40] sm:$0xf]  ;;  %236 = vst [vmem:[%s212_s9 + $0x8] sm:$0xf] %v235_v2 }
  0x13   : > { %238 = vst [vmem:[%s212_s9 + $0xc] sm:$0xf] %v237_v3  ;;  %240 = vst [vmem:[%s212_s9 + $0x10] sm:$0xf] %v239_v4  ;;  %v241_v5 = vld [vmem:[%s1062_s8 + $0x50] sm:$0xf] }
  0x14   : > { %v243_v6 = vld [vmem:[%s1062_s8 + $0x60] sm:$0xf]  ;;  %v245_v7 = vld [vmem:[%s1062_s8 + $0x70] sm:$0xf]  ;;  %242 = vst [vmem:[%s212_s9 + $0x14] sm:$0xf] %v241_v5 }
  0x15   : > { %244 = vst [vmem:[%s212_s9 + $0x18] sm:$0xf] %v243_v6  ;;  %246 = vst [vmem:[%s212_s9 + $0x1c] sm:$0xf] %v245_v7  ;;  %v247_v8 = vld [vmem:[%s1062_s8 + $0x80] sm:$0xf] }
  0x16   : > { %v249_v9 = vld [vmem:[%s1062_s8 + $0x90] sm:$0xf]  ;;  %v251_v10 = vld [vmem:[%s1062_s8 + $0xa0] sm:$0xf]  ;;  %248 = vst [vmem:[%s212_s9 + $0x20] sm:$0xf] %v247_v8 }
  0x17   : > { %250 = vst [vmem:[%s212_s9 + $0x24] sm:$0xf] %v249_v9  ;;  %252 = vst [vmem:[%s212_s9 + $0x28] sm:$0xf] %v251_v10  ;;  %v253_v11 = vld [vmem:[%s1062_s8 + $0xb0] sm:$0xf] }
  0x18   : > { %v255_v12 = vld [vmem:[%s1062_s8 + $0xc0] sm:$0xf]  ;;  %v257_v13 = vld [vmem:[%s1062_s8 + $0xd0] sm:$0xf]  ;;  %254 = vst [vmem:[%s212_s9 + $0x2c] sm:$0xf] %v253_v11 }
  0x19   : > { %256 = vst [vmem:[%s212_s9 + $0x30] sm:$0xf] %v255_v12  ;;  %258 = vst [vmem:[%s212_s9 + $0x34] sm:$0xf] %v257_v13  ;;  %v259_v14 = vld [vmem:[%s1062_s8 + $0xe0] sm:$0xf] }
  0x1a   : > { %v261_v15 = vld [vmem:[%s1062_s8 + $0xf0] sm:$0xf]  ;;  %260 = vst [vmem:[%s212_s9 + $0x38] sm:$0xf] %v259_v14 }
  0x1b   : > { %262 = vst [vmem:[%s212_s9 + $0x3c] sm:$0xf] %v261_v15 }
  0x1c PF: > { %p758_p6 = scmp.ge.s32.totalorder %s980_s22, 1  ;;  %p332_p7 = scmp.lt.s32.totalorder %s980_s22, 5 }
  0x1e   : > { %p333_p8 = pnand %p758_p6, %p332_p7 }
  0x1f   : > { %s339_s10 = sand.u32 (!%p333_p8), 1, %s964_s18   ;;  %p380_p9 = scmp.lt.s32.totalorder (!%p333_p8), %s972_s20, 3 }
  0x20   : > { %336 = sbr.rel (%p333_p8) target bundleno = 507 (0x1fb), region = 77  ;;  %s759_s11 = sshll.u32 (!%p333_p8), %s339_s10, 6 }
  0x21   : > { %s760_s12 = sshll.u32 (!%p333_p8), %s972_s20, 4  ;;  %s1097_s29 = scalar_lea.vmem (!%p333_p8), [#allocation3], %s759_s11 }
  0x22   : > { %p384_p10 = scmp.lt.s32.totalorder (!%p333_p8), %s760_s12, 63  ;;  %p762_p11 = scmp.ne.s32.totalorder (!%p333_p8), %s972_s20, 0 }
  0x25   : > { %s1086_s13 = scalar_select %p380_p9, %s972_s20, 3 }
  0x26   : > { %s1174_s12 = smov (!%p384_p10, %s760_s12), 63  ;;  %394 = sbr.rel (%p762_p11) target bundleno = 45 (0x2d), region = 85 }
  0x27   : > { %s382_s16 = scalar_lea.vmem %s1162_s2, %s1086_s13  ;;  %s761_s17 = sshll.u32 %s1174_s12, 2 }
  0x28   : > { %s1095_s28 = scalar_lea.vmem %s1163_s3, %s761_s17 }
  0x2b   : > { %v982_v16 = vmov 0.0  }
  0x2c   : > { %395 = vst [vmem:[#allocation2] sm:$0xff] %v982_v16  ;;  %396 = vst [vmem:[#allocation2 + $0x8] sm:$0xff] %v982_v16 }
  0x2d PF: > { %v897_v17 = vld [vmem:[%s1097_s29 + $0x38] sm:$0xff]   ;;  %v983_v18 = vmov 0.0   ;;  %v898_v19 = vld [vmem:[%s1097_s29 + $0x30] sm:$0xff]   ;;  %vm984_vm0 = vmmov 0   ;;  %v899_v20 = vld [vmem:[%s1097_s29 + $0x28] sm:$0xff]   ;;  %p781_p12 = scmp.ne.s32.totalorder %s972_s20, 3 }
  0x2e   : > { %805 = vmatprep.subr.bf16.mxu0 %v983_v18  ;;  %825 = vmatprep.subr.bf16.mxu1 %v983_v18  ;;  %v906_v21 = vld [vmem:[%s1095_s28 + $0x38] sm:$0xff]   ;;  %v900_v22 = vld [vmem:[%s1097_s29 + $0x20] sm:$0xff]   ;;  %v901_v24 = vld [vmem:[%s1097_s29 + $0x18] sm:$0xff]  }
  0x2f   : > { %806 = vmatpush3.bf16.msra.mxu0 %v897_v17  ;;  %821 = vmatprep.mubr.msk.bf16.mxu0 %vm984_vm0, %v983_v18  ;;  %v907_v23 = vld [vmem:[%s1095_s28 + $0x30] sm:$0xff]   ;;  %v908_v25 = vld [vmem:[%s1095_s28 + $0x28] sm:$0xff]   ;;  %v902_v26 = vld [vmem:[%s1097_s29 + $0x10] sm:$0xff]  }
  0x30   : > { %807 = vmatprep.subr.bf16.mxu0 %v983_v18  ;;  %841 = vmatprep.mubr.msk.bf16.mxu1 %vm984_vm0, %v983_v18  ;;  %v909_v27 = vld [vmem:[%s1095_s28 + $0x20] sm:$0xff]   ;;  %v903_v28 = vld [vmem:[%s1097_s29 + $0x8] sm:$0xff]   ;;  %v904_v30 = vld [vmem:[%s1097_s29] sm:$0xff]  }
  0x31   : > { %826 = vmatpush3.bf16.msra.mxu1 %v906_v21  ;;  %v910_v29 = vld [vmem:[%s1095_s28 + $0x18] sm:$0xff]   ;;  %v905_v31 = vld [vmem:[%s1160_s0] sm:$0xff]   ;;  %v911_v32 = vld [vmem:[%s1095_s28 + $0x10] sm:$0xff]  }
  0x32   : > { %827 = vmatprep.subr.bf16.mxu1 %v983_v18  ;;  %v912_v33 = vld [vmem:[%s1095_s28 + $0x8] sm:$0xff]   ;;  %v913_v34 = vld [vmem:[%s1095_s28] sm:$0xff]  }
  0x33   : > { %808 = vmatpush3.bf16.msra.mxu0 %v898_v19  ;;  %v763_v35 = vld [vmem:[%s382_s16] ss:$0 sm:$0xff]  ;;  %v520_v49 = vld [vmem:[#allocation2 + $0x8] sm:$0xff] }
  0x34   : > { %809 = vmatprep.subr.bf16.mxu0 %v983_v18  ;;  %v519_v45 = vld [vmem:[#allocation2] sm:$0xff] }
  0x35   : > { %828 = vmatpush3.bf16.msra.mxu1 %v907_v23 }
  0x36   : > { %829 = vmatprep.subr.bf16.mxu1 %v983_v18 }
  0x37   : > { %810 = vmatpush3.bf16.msra.mxu0 %v899_v20 }
  0x38   : > { %811 = vmatprep.subr.bf16.mxu0 %v983_v18 }
  0x39   : > { %830 = vmatpush3.bf16.msra.mxu1 %v908_v25 }
  0x3a   : > { %831 = vmatprep.subr.bf16.mxu1 %v983_v18 }
  0x3b   : > { %812 = vmatpush3.bf16.msra.mxu0 %v900_v22 }
  0x3c   : > { %813 = vmatprep.subr.bf16.mxu0 %v983_v18 }
  0x3d   : > { %832 = vmatpush3.bf16.msra.mxu1 %v909_v27 }
  0x3e   : > { %833 = vmatprep.subr.bf16.mxu1 %v983_v18 }
  0x3f   : > { %814 = vmatpush3.bf16.msra.mxu0 %v901_v24 }
  0x40   : > { %815 = vmatprep.subr.bf16.mxu0 %v983_v18 }
  0x41   : > { %834 = vmatpush3.bf16.msra.mxu1 %v910_v29 }
  0x42   : > { %835 = vmatprep.subr.bf16.mxu1 %v983_v18 }
  0x43   : > { %816 = vmatpush3.bf16.msra.mxu0 %v902_v26 }
  0x44   : > { %817 = vmatprep.subr.bf16.mxu0 %v983_v18 }
  0x45   : > { %836 = vmatpush3.bf16.msra.mxu1 %v911_v32 }
  0x46   : > { %837 = vmatprep.subr.bf16.mxu1 %v983_v18 }
  0x47   : > { %818 = vmatpush3.bf16.msra.mxu0 %v903_v28 }
  0x48   : > { %819 = vmatprep.subr.bf16.mxu0 %v983_v18 }
  0x49   : > { %838 = vmatpush3.bf16.msra.mxu1 %v912_v33 }
  0x4a   : > { %839 = vmatprep.subr.bf16.mxu1 %v983_v18 }
  0x4b   : > { %820 = vmatpush3.bf16.msra.mxu0 %v904_v30 }
  0x4d   : > { %840 = vmatpush3.bf16.msra.mxu1 %v913_v34 }
  0x4e   : > { %822 = vmatmul.mubr.bf16.vlgmr.msra.gmra.mxu0 %v905_v31 }
 0x10e   : > { %v510_v36 = vpop.f32.mrf.mxu0 }
 0x10f   : > { %v511_v38 = vadd.f32 %v763_v35, %v510_v36 }
 0x110   : > { %v823_v37 = vpop.f32.mrf.mxu0 }
 0x111   : > { %v517_v42 = vmax.f32 %v511_v38, 0.0 }
 0x112   : > { %v513_v39 = vpop.f32.mrf.mxu0 }
 0x113   : > { %v514_v40 = vadd.f32 %v763_v35, %v513_v39 }
 0x114   : > { %v824_v41 = vpop.f32.mrf.mxu0 }
 0x115   : > { %v518_v43 = vmax.f32 %v514_v40, 0.0 }
 0x117   : > { %v521_v44 = vpack.c.bf16 %v518_v43, %v517_v42 }
 0x119   : > { %842 = vmatmul.mubr.bf16.vlgmr.msra.gmra.mxu1 %v521_v44 }
 0x1d9   : > { %v620_v46 = vpop.f32.mrf.mxu1 }
 0x1da   : > { %v627_v47 = vadd.f32 %v620_v46, %v519_v45 }
 0x1db   : > { %v843_v48 = vpop.f32.mrf.mxu1 }
 0x1dc   : > { %629 = vst [vmem:[#allocation2] sm:$0xff] %v627_v47  ;;  %634 = sbr.rel (%p781_p12) target bundleno = 491 (0x1eb), region = 89 }
 0x1dd   : > { %v623_v50 = vpop.f32.mrf.mxu1 }
 0x1de   : > { %v628_v51 = vadd.f32 %v623_v50, %v520_v49 }
 0x1df   : > { %v844_v52 = vpop.f32.mrf.mxu1 }
 0x1e0   : > { %630 = vst [vmem:[#allocation2 + $0x8] sm:$0xff] %v628_v51 }
 0x1e1   : > { %v782_v54 = vld [vmem:[%s1164_s4] ss:$0 sm:$0xff] }
 0x1e3   : > { %v635_v53 = vld [vmem:[#allocation2] sm:$0xff] }
 0x1e4   : > { %v644_v56 = vadd.f32 %v782_v54, %v635_v53 }
 0x1e6   : > { %646 = vst [vmem:[#allocation4] sm:$0xff] %v644_v56 }
 0x1e7   : > { %v636_v55 = vld [vmem:[#allocation2 + $0x8] sm:$0xff] }
 0x1e8   : > { %v645_v57 = vadd.f32 %v782_v54, %v636_v55 }
 0x1ea   : > { %647 = vst [vmem:[#allocation4 + $0x8] sm:$0xff] %v645_v57 }
 0x1eb PF: > { %p1130_p13 = scmp.eq.s32.totalorder %s752_s23, 3  ;;  %s985_s20 = smov [#allocation4]  }
 0x1ec   : > { %s657_s11 = sshll.u32 %s985_s20, 4  ;;  %s658_s11 = int_to_ptr.vmem [resolvable:$true] %s657_s11 }
 0x1ed   : > { %s914_s12 = scalar_lea.vmem %s658_s11, 256  ;;  %p921_p3 = scmp.lt.s32.totalorder %s658_s11, %s658_s11 }
 0x1ee   : > { %p915_p0 = scmp.ne.s32.totalorder %s658_s11, %s914_s12  ;;  %p922_p4 = scmp.lt.s32.totalorder %s914_s12, %s914_s12 }
 0x1f0   : > { %p916_p1 = pnand %p915_p0, %p1130_p13  ;;  %p923_p5 = por %p922_p4, %p921_p3 }
 0x1f2   : > { %p917_p2 = pneg %p916_p1 }
 0x1f4   : > { %p924_p6 = pnand %p923_p5, %p917_p2 }
 0x1f6   : > { %927 = shalt.err (!%p924_p6)
}
 0x1f7   : > { %s986_s13 = smov 128   ;;  %s987_s23 = smov 8  }
 0x1f8   : > { %846 = dma.vmem_to_hbm [thread:$0]  (%p1130_p13), %s658_s11, 256, %s1165_s5, [#allocation5], %s986_s13, %s986_s13, %s987_s23  }
 0x1f9   : > { %959 = dma.done.wait (%p1130_p13), [#allocation5], 256  }
 0x1fa   : > { %961 = vsyncadd (%p1130_p13), [#allocation5], 4294967040 }
 0x1fb PF: > { %s16_s22 = sadd.s32 1, %s980_s22   ;;  %s1167_s18 = smov %s968_s19 }
 0x1fc   : > { %p13_p7 = scmp.ge.s32.totalorder %s16_s22, 6   ;;  %s1168_s19 = smov %s1054_s27 }
 0x1fd   : > { %s1169_s20 = smov %s976_s21  ;;  %s1170_s21 = smov %s1172_s24 }
 0x1fe   :  { %15 = sbr.rel (!%p13_p7) target bundleno = 3 (0x3), region = 131 }
 0x203   :  { %673 = vsyncpa [#allocation5], 1 }
 0x204   :  { %675 = vsyncpa [#allocation5 + $0x1], 1 }

</bundles_post_ra>
